<compile_context>
chip_gen: v5e
topology: v5e:2x2
jax: 0.10.0
libtpu: 0.0.40
codegen_flags: <defaults>
</compile_context>

<pallas_src>
import functools

import jax
import jax.numpy as jnp
from jax import lax
from jax.experimental import pallas as pl
from jax.experimental.pallas import tpu as pltpu

ALPHA = 0.25   # module __init__ default
GAMMA = 2      # module __init__ default


def _focal_kernel(x_ref, t_ref, o_ref, *, alpha, gamma, chunk, unroll,
                  approx_recip):
    """Per-block focal-loss partial sums.

    x_ref: VMEM (block_rows, 128) logits tile (f32 or bf16)
    t_ref: VMEM (block_rows, 128) binary targets tile (int8 / bool / float 0-1)
    o_ref: VMEM (1, 8, 128)       per-core vector accumulator (output block,
                                  resident across the inner reduction axis)
    """
    @pl.when(pl.program_id(1) == 0)
    def _init():
        o_ref[...] = jnp.zeros_like(o_ref)

    n_chunks = x_ref.shape[0] // chunk

    def body(j, acc):
        r0 = pl.multiple_of(j * chunk, chunk)
        x = x_ref[pl.ds(r0, chunk), :].astype(jnp.float32)
        t = t_ref[pl.ds(r0, chunk), :]
        tpos = t.astype(jnp.float32) > 0.5          # binary 0/1 targets
        # TODO(synk): soft (non-binary) float targets use torch's gather-with-
        # truncation semantics; this kernel assumes hard 0/1 targets (the
        # module's intended use via alpha.gather).

        # Stable binary_cross_entropy_with_logits (reduction='none'):
        #   BCE = max(x, 0) - x * t + log1p(exp(-|x|))
        e = jnp.exp(-jnp.abs(x))                    # EUP; reused below
        bce = jnp.maximum(x, 0.0) - jnp.where(tpos, x, 0.0) + jnp.log1p(e)

        # d = 1 - pt = 1 - exp(-BCE), without forming pt or a second exp:
        #   exp(-BCE) = num / (1 + e),  num = e if (t==1) xor (x>=0) else 1
        #   => d = where((t==1) == (x<0), 1, e) / (1 + e)
        d_num = jnp.where(tpos == (x < 0.0), 1.0, e)
        denom = 1.0 + e
        if approx_recip:
            d = d_num * pl.reciprocal(denom, approx=True)   # EUP vrcp
        else:
            d = d_num / denom

        # at = alpha.gather(0, targets.long()):  t==0 -> alpha,  t==1 -> 1-alpha
        at = jnp.where(tpos, 1.0 - alpha, alpha)

        if isinstance(gamma, int):
            mod = jnp.ones_like(d) if gamma == 0 else d
            for _ in range(max(gamma - 1, 0)):
                mod = mod * d                       # gamma=2 -> d*d, no pow
        else:
            mod = d ** gamma

        f = at * mod * bce
        # (chunk,128) -> (8,128) partial sum: pure VPU adds, no (8,128)-tile
        # boundary crossing, stays in vregs.
        return acc + jnp.sum(f.reshape(chunk // 8, 8, 128), axis=0)

    acc = lax.fori_loop(0, n_chunks, body,
                        jnp.zeros((8, 128), jnp.float32), unroll=unroll)
    o_ref[...] += acc[None, :, :]


def _cdiv(a, b):
    return -(-a // b)


def _round_up(a, b):
    return _cdiv(a, b) * b


def _num_tensorcores():
    """Best-effort TensorCores-per-device; v5e/v6e are single-TC parts."""
    try:
        kind = jax.devices()[0].device_kind.lower()
    except Exception:
        return 1
    return 2 if "v7" in kind else 1


def focal_with_logits_second(inputs, targets, *, alpha=ALPHA, gamma=GAMMA,
                             max_block_rows=8192, chunk_rows=256,
                             approx_reciprocal=True, num_cores=None):
    """Pallas implementation of FocalWithLogitsSecond.forward (scalar mean)."""
    x = jnp.asarray(inputs).reshape(-1)
    if not jnp.issubdtype(x.dtype, jnp.floating):
        x = x.astype(jnp.float32)
    t = jnp.asarray(targets).reshape(-1)
    if t.dtype == jnp.bool_:
        t = t.astype(jnp.int8)      # keep the target stream narrow; no f32 cast
    assert x.shape == t.shape
    n = x.shape[0]

    if num_cores is None:
        num_cores = _num_tensorcores()

    # --- Row tiling over a (rows, 128) lane-dense view.  All row counts are
    # multiples of 32 so int8 targets stay tile-aligned (32-sublane packing).
    rows = _cdiv(n, 128)
    cap = max(32, _round_up(min(max_block_rows, rows), 32))
    chunk = min(_round_up(min(chunk_rows, cap), 32), cap)
    cap = max(chunk, (cap // chunk) * chunk)
    n_blocks = _cdiv(rows, cap)
    block_rows = min(cap, _round_up(_cdiv(rows, n_blocks), chunk))
    n_blocks = _round_up(_cdiv(rows, block_rows), num_cores)
    inner = n_blocks // num_cores
    rows_padded = n_blocks * block_rows

    # --- Pad with loss-neutral elements (x=+100, t=1 => focal loss exactly 0
    # in f32), so the mean below can divide by the true n.
    pad = rows_padded * 128 - n
    if pad:
        x = jnp.concatenate([x, jnp.full((pad,), 100.0, x.dtype)])
        t = jnp.concatenate([t, jnp.ones((pad,), t.dtype)])
    x2 = x.reshape(rows_padded, 128)
    t2 = t.reshape(rows_padded, 128)

    n_chunks = block_rows // chunk
    unroll = (True if n_chunks <= 8 else
              4 if n_chunks % 4 == 0 else
              2 if n_chunks % 2 == 0 else 1)

    kernel = functools.partial(
        _focal_kernel, alpha=float(alpha), gamma=gamma, chunk=chunk,
        unroll=unroll, approx_recip=approx_reciprocal)

    outer_sem = pltpu.CORE_PARALLEL if num_cores > 1 else pltpu.ARBITRARY

    partials = pl.pallas_call(
        kernel,
        out_shape=jax.ShapeDtypeStruct((num_cores, 8, 128), jnp.float32),
        grid_spec=pltpu.PrefetchScalarGridSpec(
            num_scalar_prefetch=0,
            grid=(num_cores, inner),
            in_specs=[
                pl.BlockSpec((block_rows, 128), lambda c, i: (c * inner + i, 0)),
                pl.BlockSpec((block_rows, 128), lambda c, i: (c * inner + i, 0)),
            ],
            out_specs=pl.BlockSpec((1, 8, 128), lambda c, i: (c, 0, 0)),
        ),
        compiler_params=pltpu.CompilerParams(
            dimension_semantics=(outer_sem, pltpu.ARBITRARY),
            vmem_limit_bytes=32 * 1024 * 1024,
        ),
    )(x2, t2)

    return jnp.sum(partials) / n


def _reference(inputs, targets, alpha=ALPHA, gamma=GAMMA):
    """Plain-JAX reference mirroring the PyTorch forward."""
    x = jnp.asarray(inputs, jnp.float32).reshape(-1)
    t = jnp.asarray(targets, jnp.float32).reshape(-1)
    bce = jnp.maximum(x, 0.0) - x * t + jnp.log1p(jnp.exp(-jnp.abs(x)))
    alpha_vec = jnp.array([alpha, 1.0 - alpha], dtype=jnp.float32)
    at = alpha_vec[t.astype(jnp.int32)]
    pt = jnp.exp(-bce)
    return jnp.mean(at * (1.0 - pt) ** gamma * bce)


if __name__ == "__main__":
    key = jax.random.PRNGKey(0)
    k_x, k_t, k_x2, k_t2 = jax.random.split(key, 4)

    # Small dense-prediction-style shape (B, C, H, W); int8 binary targets
    # exercise the narrow-target HBM path.  Flat size 2048 (not a multiple of
    # the 32x128 block) also exercises the loss-neutral tail padding.
    shape = (2, 4, 16, 16)
    inputs = jax.random.normal(k_x, shape, dtype=jnp.float32) * 2.0
    targets = jax.random.bernoulli(k_t, p=0.3, shape=shape).astype(jnp.int8)

    ref = jax.block_until_ready(_reference(inputs, targets))
    out = jax.block_until_ready(focal_with_logits_second(inputs, targets))
    assert jnp.allclose(out, ref, rtol=2e-3, atol=1e-5), (out, ref)

    # Ragged flat size + tiny block cap: padding, a 5-step inner reduction
    # grid (resident accumulator), and the exact (non-approx) reciprocal path.
    n2 = 40000
    inputs2 = jax.random.normal(k_x2, (n2,), dtype=jnp.float32) * 3.0
    targets2 = jax.random.bernoulli(k_t2, p=0.5, shape=(n2,)).astype(jnp.int8)
    ref2 = jax.block_until_ready(_reference(inputs2, targets2))
    out2 = jax.block_until_ready(
        focal_with_logits_second(inputs2, targets2, max_block_rows=64,
                                 approx_reciprocal=False))
    assert jnp.allclose(out2, ref2, rtol=5e-4, atol=1e-6), (out2, ref2)

    print("KERNEL_OK")
</pallas_src>

<mosaic_0001>
module attributes {stable_mosaic.version = 11 : i64} {
  func.func @_focal_kernel(%arg0: i32, %arg1: i32, %arg2: memref<32x128xf32, #tpu.memory_space<vmem>>, %arg3: memref<32x128xi8, #tpu.memory_space<vmem>>, %arg4: memref<1x8x128xf32, #tpu.memory_space<vmem>>) attributes {dimension_semantics = [#tpu.dimension_semantics<arbitrary>, #tpu.dimension_semantics<arbitrary>], iteration_bounds = array<i64: 1, 1>, scalar_prefetch = 0 : i64, scratch_operands = 0 : i64, tpu.core_type = #tpu.core_type<tc>, window_params = [{transform_indices = @transform_0, window_bounds = array<i64: 32, 128>}, {transform_indices = @transform_1, window_bounds = array<i64: 32, 128>}, {transform_indices = @transform_2, window_bounds = array<i64: 1, 8, 128>}]} {
    %c0_i32 = arith.constant 0 : i32
    %0 = arith.cmpi eq, %arg1, %c0_i32 : i32
    %1 = arith.extui %0 : i1 to i32
    %c0_i32_0 = arith.constant 0 : i32
    %2 = arith.cmpi ne, %1, %c0_i32_0 : i32
    scf.if %2 {
      %cst_20 = arith.constant 0.000000e+00 : f32
      %47 = vector.broadcast %cst_20 : f32 to vector<1x8x128xf32>
      %c0_21 = arith.constant 0 : index
      %c0_22 = arith.constant 0 : index
      %c0_23 = arith.constant 0 : index
      %48 = vector.load %arg4[%c0_21, %c0_22, %c0_23] : memref<1x8x128xf32, #tpu.memory_space<vmem>>, vector<1x8x128xf32>
      tpu.vector_store %arg4[%c0_21, %c0_22, %c0_23], %47 {strides = array<i32>} : memref<1x8x128xf32, #tpu.memory_space<vmem>>, vector<1x8x128xf32>,
    } else {
    }
    %cst = arith.constant 0.000000e+00 : f32
    %3 = vector.broadcast %cst : f32 to vector<8x128xf32>
    %c0_i32_1 = arith.constant 0 : i32
    %c32_i32 = arith.constant 32 : i32
    %4 = arith.muli %c0_i32_1, %c32_i32 : i32
    %5 = tpu.assume_multiple %4, 32 : i32
    %6 = arith.index_cast %5 : i32 to index
    %c0 = arith.constant 0 : index
    %7 = vector.load %arg2[%6, %c0] : memref<32x128xf32, #tpu.memory_space<vmem>>, vector<32x128xf32>
    %8 = arith.index_cast %5 : i32 to index
    %c0_2 = arith.constant 0 : index
    %9 = vector.load %arg3[%8, %c0_2] : memref<32x128xi8, #tpu.memory_space<vmem>>, vector<32x128xi8>
    %10 = arith.sitofp %9 : vector<32x128xi8> to vector<32x128xf32>
    %cst_3 = arith.constant 5.000000e-01 : f32
    %11 = vector.broadcast %cst_3 : f32 to vector<32x128xf32>
    %12 = arith.cmpf ogt, %10, %11 : vector<32x128xf32>
    %13 = math.absf %7 : vector<32x128xf32>
    %cst_4 = arith.constant 0.000000e+00 : f32
    %14 = vector.broadcast %cst_4 : f32 to vector<32x128xf32>
    %15 = arith.subf %14, %13 : vector<32x128xf32>
    %16 = math.exp %15 : vector<32x128xf32>
    %cst_5 = arith.constant 0.000000e+00 : f32
    %17 = vector.broadcast %cst_5 : f32 to vector<32x128xf32>
    %18 = arith.maximumf %7, %17 : vector<32x128xf32>
    %cst_6 = arith.constant 0.000000e+00 : f32
    %19 = vector.broadcast %cst_6 : f32 to vector<32x128xf32>
    %20 = arith.select %12, %7, %19 : vector<32x128xi1>, vector<32x128xf32>
    %21 = arith.subf %18, %20 : vector<32x128xf32>
    %22 = math.log1p %16 : vector<32x128xf32>
    %23 = arith.addf %21, %22 : vector<32x128xf32>
    %cst_7 = arith.constant 0.000000e+00 : f32
    %24 = vector.broadcast %cst_7 : f32 to vector<32x128xf32>
    %25 = arith.cmpf olt, %7, %24 : vector<32x128xf32>
    %26 = arith.xori %12, %25 : vector<32x128xi1>
    %cst_8 = arith.constant dense<true> : vector<32x128xi1>
    %27 = arith.xori %26, %cst_8 : vector<32x128xi1>
    %cst_9 = arith.constant 1.000000e+00 : f32
    %28 = vector.broadcast %cst_9 : f32 to vector<32x128xf32>
    %29 = arith.select %27, %28, %16 : vector<32x128xi1>, vector<32x128xf32>
    %cst_10 = arith.constant 1.000000e+00 : f32
    %30 = vector.broadcast %cst_10 : f32 to vector<32x128xf32>
    %31 = arith.addf %30, %16 : vector<32x128xf32>
    %32 = tpu.reciprocal %31 {approx = true} : vector<32x128xf32> -> vector<32x128xf32>
    %33 = arith.mulf %29, %32 : vector<32x128xf32>
    %cst_11 = arith.constant 7.500000e-01 : f32
    %cst_12 = arith.constant 2.500000e-01 : f32
    %34 = vector.broadcast %cst_11 : f32 to vector<32x128xf32>
    %35 = vector.broadcast %cst_12 : f32 to vector<32x128xf32>
    %36 = arith.select %12, %34, %35 : vector<32x128xi1>, vector<32x128xf32>
    %37 = arith.mulf %33, %33 : vector<32x128xf32>
    %38 = arith.mulf %36, %37 : vector<32x128xf32>
    %39 = arith.mulf %38, %23 : vector<32x128xf32>
    %40 = vector.shape_cast %39 : vector<32x128xf32> to vector<4x8x128xf32>
    %cst_13 = arith.constant dense<0.000000e+00> : vector<8x128xf32>
    %41 = vector.multi_reduction <add>, %40, %cst_13 [0] : vector<4x8x128xf32> to vector<8x128xf32>
    %42 = arith.addf %3, %41 : vector<8x128xf32>
    %c1_i32 = arith.constant 1 : i32
    %c0_14 = arith.constant 0 : index
    %c0_15 = arith.constant 0 : index
    %c0_16 = arith.constant 0 : index
    %43 = vector.load %arg4[%c0_14, %c0_15, %c0_16] : memref<1x8x128xf32, #tpu.memory_space<vmem>>, vector<1x8x128xf32>
    %44 = vector.shape_cast %42 : vector<8x128xf32> to vector<1x8x128xf32>
    %45 = arith.addf %43, %44 : vector<1x8x128xf32>
    %c0_17 = arith.constant 0 : index
    %c0_18 = arith.constant 0 : index
    %c0_19 = arith.constant 0 : index
    %46 = vector.load %arg4[%c0_17, %c0_18, %c0_19] : memref<1x8x128xf32, #tpu.memory_space<vmem>>, vector<1x8x128xf32>
    tpu.vector_store %arg4[%c0_17, %c0_18, %c0_19], %45 {strides = array<i32>} : memref<1x8x128xf32, #tpu.memory_space<vmem>>, vector<1x8x128xf32>,
    return
  }
  func.func @transform_0(%arg0: i32, %arg1: i32) -> (i32, i32) {
    %c1_i32 = arith.constant 1 : i32
    %0 = arith.muli %arg0, %c1_i32 : i32
    %1 = arith.addi %0, %arg1 : i32
    %c0_i32 = arith.constant 0 : i32
    %c0_i32_0 = arith.constant 0 : i32
    return %1, %c0_i32 : i32, i32
  }
  func.func @transform_1(%arg0: i32, %arg1: i32) -> (i32, i32) {
    %c1_i32 = arith.constant 1 : i32
    %0 = arith.muli %arg0, %c1_i32 : i32
    %1 = arith.addi %0, %arg1 : i32
    %c0_i32 = arith.constant 0 : i32
    %c0_i32_0 = arith.constant 0 : i32
    return %1, %c0_i32 : i32, i32
  }
  func.func @transform_2(%arg0: i32, %arg1: i32) -> (i32, i32, i32) {
    %c0_i32 = arith.constant 0 : i32
    %c0_i32_0 = arith.constant 0 : i32
    %c0_i32_1 = arith.constant 0 : i32
    return %arg0, %c0_i32, %c0_i32_0 : i32, i32, i32
  }
}

</mosaic_0001>

<bundles_post_ra>
// kernel: tpu_custom_call.1
= control target key start
LH: loop header
LB: loop body
LE: loop exit
PB: predicated region body
PF: predicated region fallthrough
CT: control target
= control target key end

     0   :  { %7 = vsyncpa [#allocation3], 0  ;;  %s520_s0 = inlined_call_operand.hbm [shape: f32[32,128], index: 0, kind: input, shape index: {}]   ;;  %s521_s1 = inlined_call_operand.hbm [shape: s8[32,128], index: 1, kind: input, shape index: {}]   ;;  %s522_s2 = inlined_call_operand.hbm [shape: f32[1,8,128], index: 2, kind: output, shape index: {}]  }
   0x1   :  { %8 = vsyncpa [#allocation6], 0 }
   0x2   :  { %9 = vsyncpa [#allocation4], 0  ;;  %s18_s11 = sshll.u32 %s520_s0, 4  ;;  %s321_s12 = smov [#allocation2]   ;;  %s19_s11 = int_to_ptr.hbm [resolvable:$true] %s18_s11 }
   0x3   :  { %s20_s13 = sshll.u32 %s321_s12, 4  ;;  %s35_s16 = sshll.u32 %s521_s1, 4  ;;  %s21_s13 = int_to_ptr.vmem [resolvable:$true] %s20_s13  ;;  %s36_s16 = int_to_ptr.hbm [resolvable:$true] %s35_s16 }
   0x4   :  { %s322_s17 = smov 128   ;;  %s323_s18 = smov 8  }
   0x5   :  { %26 = dma.hbm_to_vmem [thread:$0]  %s19_s11, 512, %s21_s13, [#allocation3], %s322_s17, %s322_s17, %s323_s18  }
   0x6   :  { %s324_s19 = smov [#allocation5]  }
   0x7   :  { %s37_s20 = sshll.u32 %s324_s19, 4  ;;  %s38_s20 = int_to_ptr.vmem [resolvable:$true] %s37_s20 }
   0x8   :  { %40 = dma.hbm_to_vmem [thread:$0]  %s36_s16, 128, %s38_s20, [#allocation6]  }
   0x9   :  { %315 = dma.done.wait [#allocation3], 512  }
   0xa   :  { %316 = vsyncadd [#allocation3], 4294966784 }
   0xb   :  { %317 = dma.done.wait [#allocation6], 128  }
   0xc   :  { %318 = vsyncadd [#allocation6], 4294967168  ;;  %v349_v0 = vld [vmem:[#allocation2] sm:$0xff]  ;;  %v351_v1 = vld [vmem:[#allocation2 + $0x8] sm:$0xff]  ;;  %vm325_vm12 = vmmov 1   ;;  %s327_s0 = smov [#allocation7]  }
   0xd   :  { %v353_v2 = vld [vmem:[#allocation2 + $0x10] sm:$0xff]  ;;  %v355_v3 = vld [vmem:[#allocation2 + $0x18] sm:$0xff]  ;;  %v74_v4 = vand.u32 2147483647, %v349_v0  ;;  %v75_v5 = vand.u32 2147483647, %v351_v1 }
   0xe   :  { %v61_v6 = vld [vmem:[#allocation5] sm:$0xff]  ;;  %v76_v7 = vand.u32 2147483647, %v353_v2  ;;  %v77_v8 = vand.u32 2147483647, %v355_v3  ;;  %v90_v29 = vmax.f32 %v349_v0, 0.0 }
   0xf   :  { %v78_v9 = vsub.f32 0.0, %v74_v4  ;;  %v79_v10 = vsub.f32 0.0, %v75_v5  ;;  %v62_v15 = vunpack.c.0.s8 %v61_v6  ;;  %v63_v16 = vunpack.c.1.s8 %v61_v6  ;;  %s198_s1 = sshll.u32 %s327_s0, 4  ;;  %s200_s23 = sshll.u32 %s522_s2, 4  ;;  %s199_s1 = int_to_ptr.vmem [resolvable:$true] %s198_s1  ;;  %s201_s23 = int_to_ptr.hbm [resolvable:$true] %s200_s23 }
  0x10   :  { %v80_v11 = vsub.f32 0.0, %v76_v7  ;;  %v81_v12 = vsub.f32 0.0, %v77_v8  ;;  %v64_v17 = vunpack.c.2.s8 %v61_v6  ;;  %v65_v18 = vunpack.c.3.s8 %v61_v6 }
  0x11   :  { %v82_v13 = vmul.f32 1.442695, %v78_v9  ;;  %v84_v14 = vmul.f32 1.442695, %v79_v10  ;;  %v361_v21 = vcvt.s32.f32 %v62_v15  ;;  %v363_v22 = vcvt.s32.f32 %v63_v16 }
  0x12   :  { %v86_v19 = vmul.f32 1.442695, %v80_v11  ;;  %v88_v20 = vmul.f32 1.442695, %v81_v12  ;;  %v365_v23 = vcvt.s32.f32 %v64_v17  ;;  %v367_v24 = vcvt.s32.f32 %v65_v18 }
  0x13   :  { %219 = vpow2.f32 %v82_v13  ;;  %vm70_vm0 = vcmp.gt.f32.partialorder %v361_v21, 0.5  ;;  %vm71_vm1 = vcmp.gt.f32.partialorder %v363_v22, 0.5  ;;  %vm142_vm4 = vcmp.lt.f32.partialorder %v349_v0, 0.0 }
  0x14   :  { %221 = vpow2.f32 %v84_v14  ;;  %vm72_vm2 = vcmp.gt.f32.partialorder %v365_v23, 0.5  ;;  %vm73_vm3 = vcmp.gt.f32.partialorder %v367_v24, 0.5  ;;  %v91_v34 = vmax.f32 %v351_v1, 0.0  ;;  %vm401_vm8 = vmxor %vm70_vm0, %vm142_vm4 }
  0x15   :  { %223 = vpow2.f32 %v86_v19  ;;  %vm143_vm5 = vcmp.lt.f32.partialorder %v351_v1, 0.0  ;;  %vm144_vm6 = vcmp.lt.f32.partialorder %v353_v2, 0.0  ;;  %v92_v38 = vmax.f32 %v353_v2, 0.0  ;;  %vm443_vm13 = vmxor %vm401_vm8, %vm325_vm12 }
  0x16   :  { %225 = vpow2.f32 %v88_v20  ;;  %v94_v39 = vsel %vm70_vm0, %v349_v0, 0.0  ;;  %vm145_vm7 = vcmp.lt.f32.partialorder %v355_v3, 0.0  ;;  %v93_v42 = vmax.f32 %v355_v3, 0.0  ;;  %vm411_vm9 = vmxor %vm71_vm1, %vm143_vm5 }
  0x17   :  { %v95_v43 = vsel %vm71_vm1, %v351_v1, 0.0  ;;  %v96_v46 = vsel %vm72_vm2, %v353_v2, 0.0  ;;  %v97_v47 = vsel %vm73_vm3, %v355_v3, 0.0  ;;  %vm426_vm10 = vmxor %vm72_vm2, %vm144_vm6  ;;  %v98_v52 = vsub.f32 %v90_v29, %v94_v39 }
  0x18   :  { %vm435_vm11 = vmxor %vm73_vm3, %vm145_vm7  ;;  %v99_v57 = vsub.f32 %v91_v34, %v95_v43  ;;  %v100_v17 = vsub.f32 %v92_v38, %v96_v46 }
  0x19   :  { %v369_v25 = vpop.eup %219  ;;  %vm452_vm14 = vmxor %vm411_vm9, %vm325_vm12 }
  0x1a   :  { %v371_v26 = vpop.eup %221  ;;  %v102_v27 = vadd.f32 1.0, %v369_v25  ;;  %v105_v32 = vmul.f32 -0.5, %v369_v25  ;;  %v108_v48 = vand.u32 2147483647, %v369_v25  ;;  %vm464_vm4 = vmxor %vm426_vm10, %vm325_vm12  ;;  %v154_v11 = vsel %vm443_vm13, 1.0, %v369_v25 }
  0x1b   :  { %v376_v28 = vpop.eup %223  ;;  %v111_v30 = vadd.f32 1.0, %v371_v26  ;;  %v114_v35 = vmul.f32 -0.5, %v371_v26  ;;  %v117_v53 = vand.u32 2147483647, %v371_v26  ;;  %vm476_vm6 = vmxor %vm435_vm11, %vm325_vm12  ;;  %v155_v15 = vsel %vm452_vm14, 1.0, %v371_v26 }
  0x1c   :  { %v382_v31 = vpop.eup %225  ;;  %227 = vlog2.f32 %v102_v27  ;;  %v120_v33 = vadd.f32 1.0, %v376_v28  ;;  %v123_v36 = vmul.f32 -0.5, %v376_v28  ;;  %v106_v44 = vadd.f32 1.0, %v105_v32 }
  0x1d   :  { %229 = vlog2.f32 %v111_v30  ;;  %v129_v37 = vadd.f32 1.0, %v382_v31  ;;  %v132_v40 = vmul.f32 -0.5, %v382_v31  ;;  %v115_v49 = vadd.f32 1.0, %v114_v35 }
  0x1e   :  { %231 = vlog2.f32 %v120_v33  ;;  %v124_v54 = vadd.f32 1.0, %v123_v36  ;;  %v126_v58 = vand.u32 2147483647, %v376_v28  ;;  %v107_v63 = vmul.f32 %v369_v25, %v106_v44 }
  0x1f   :  { %233 = vlog2.f32 %v129_v37  ;;  %v133_v59 = vadd.f32 1.0, %v132_v40  ;;  %v135_v0 = vand.u32 2147483647, %v382_v31  ;;  %vm456_vm15 = vcmp.lt.f32.partialorder %v108_v48, 0.0004427343 }
  0x20   :  { %235 = vrcp.f32 %v102_v27  ;;  %v116_v4 = vmul.f32 %v371_v26, %v115_v49  ;;  %vm468_vm5 = vcmp.lt.f32.partialorder %v117_v53, 0.0004427343  ;;  %v125_v9 = vmul.f32 %v376_v28, %v124_v54 }
  0x21   :  { %237 = vrcp.f32 %v111_v30  ;;  %vm483_vm7 = vcmp.lt.f32.partialorder %v126_v58, 0.0004427343  ;;  %v134_v14 = vmul.f32 %v382_v31, %v133_v59  ;;  %vm493_vm8 = vcmp.lt.f32.partialorder %v135_v0, 0.0004427343 }
  0x22   :  { %v228_v51 = vpop.eup %227  ;;  %239 = vrcp.f32 %v120_v33  ;;  %v156_v20 = vsel %vm464_vm4, 1.0, %v376_v28  ;;  %v101_v27 = vsub.f32 %v93_v42, %v97_v47  ;;  %v157_v26 = vsel %vm476_vm6, 1.0, %v382_v31 }
  0x23   :  { %v230_v56 = vpop.eup %229  ;;  %v104_v62 = vmul.f32 0.6931472, %v228_v51  ;;  %241 = vrcp.f32 %v129_v37  ;;  %v326_v35 = vmov 0.25  }
  0x24   :  { %v232_v61 = vpop.eup %231  ;;  %v113_v3 = vmul.f32 0.6931472, %v230_v56  ;;  %v170_v36 = vsel %vm70_vm0, 0.75, %v326_v35  ;;  %v171_v28 = vsel %vm71_vm1, 0.75, %v326_v35  ;;  %v172_v43 = vsel %vm72_vm2, 0.75, %v326_v35 }
  0x25   :  { %v234_v6 = vpop.eup %233  ;;  %v122_v8 = vmul.f32 0.6931472, %v232_v61  ;;  %v110_v18 = vsel %vm456_vm15, %v107_v63, %v104_v62  ;;  %v173_v21 = vsel %vm73_vm3, 0.75, %v326_v35 }
  0x26   :  { %v131_v13 = vmul.f32 0.6931472, %v234_v6  ;;  %v236_v16 = vpop.eup %235  ;;  %v119_v29 = vsel %vm468_vm5, %v116_v4, %v113_v3  ;;  %v138_v39 = vadd.f32 %v110_v18, %v98_v52 }
  0x27   :  { %v238_v25 = vpop.eup %237  ;;  %v166_v30 = vmul.f32 %v236_v16, %v154_v11  ;;  %v128_v33 = vsel %vm483_vm7, %v125_v9, %v122_v8  ;;  %v139_v41 = vadd.f32 %v119_v29, %v99_v57 }
  0x28   :  { %v240_v32 = vpop.eup %239  ;;  %v167_v34 = vmul.f32 %v238_v25, %v155_v15  ;;  %v137_v38 = vsel %vm493_vm8, %v134_v14, %v131_v13  ;;  %v140_v45 = vadd.f32 %v128_v33, %v100_v17 }
  0x29   :  { %v242_v37 = vpop.eup %241  ;;  %v168_v40 = vmul.f32 %v240_v32, %v156_v20  ;;  %v174_v31 = vmul.f32 %v166_v30, %v166_v30  ;;  %v141_v47 = vadd.f32 %v137_v38, %v101_v27 }
  0x2a   :  { %v169_v42 = vmul.f32 %v242_v37, %v157_v26  ;;  %v175_v44 = vmul.f32 %v167_v34, %v167_v34 }
  0x2b   :  { %v176_v46 = vmul.f32 %v168_v40, %v168_v40  ;;  %v178_v22 = vmul.f32 %v174_v31, %v170_v36 }
  0x2c   :  { %v177_v48 = vmul.f32 %v169_v42, %v169_v42  ;;  %v179_v49 = vmul.f32 %v175_v44, %v171_v28 }
  0x2d   :  { %v180_v50 = vmul.f32 %v176_v46, %v172_v43  ;;  %v182_v51 = vmul.f32 %v178_v22, %v138_v39 }
  0x2e   :  { %v181_v52 = vmul.f32 %v177_v48, %v173_v21  ;;  %v183_v53 = vmul.f32 %v179_v49, %v139_v41 }
  0x2f   :  { %v184_v54 = vmul.f32 %v180_v50, %v140_v45 }
  0x30   :  { %v185_v55 = vmul.f32 %v181_v52, %v141_v47  ;;  %v186_v56 = vadd.f32 %v183_v53, %v182_v51 }
  0x32   :  { %v187_v57 = vadd.f32 %v186_v56, %v184_v54 }
  0x34   :  { %v188_v23 = vadd.f32 %v187_v57, %v185_v55 }
  0x36   :  { %192 = vst [vmem:[#allocation7] sm:$0xff] %v188_v23 }
  0x37   :  { %203 = dma.vmem_to_hbm [thread:$0]  %s199_s1, 128, %s201_s23, [#allocation4]  }
  0x38   :  { %319 = dma.done.wait [#allocation4], 128  }
  0x39   :  { %320 = vsyncadd [#allocation4], 4294967168 }
  0x3a   :  { %208 = vsyncpa [#allocation3], 1 }
  0x3b   :  { %209 = vsyncpa [#allocation6], 1 }
  0x3c   :  { %210 = vsyncpa [#allocation4], 1 }

</bundles_post_ra>
